<compile_context>
chip_gen: v7x
topology: tpu7x:2x2x1
jax: 0.10.0
libtpu: 0.0.40
codegen_flags: <defaults>
</compile_context>

<pallas_src>
import functools

import jax
import jax.numpy as jnp
from jax import lax
from jax.experimental import pallas as pl
from jax.experimental.pallas import tpu as pltpu


def _round_up(x, m):
    return (x + m - 1) // m * m


# ---------------------------------------------------------------------------
# Path 1: resident-table fast path (one-hot matmul gather).
# ---------------------------------------------------------------------------
def _onehot_embed_kernel(ids_ref, w_ref, out_ref, *, vocab_start, part_vocab):
    # ids_ref: (T, 1) int32, w_ref: (part_vocab, dim), out_ref: (T, dim)
    local = ids_ref[...] - vocab_start                          # (T, 1)
    cols = lax.broadcasted_iota(jnp.int32, (local.shape[0], part_vocab), 1)
    # Tokens outside [vocab_start, vocab_end) (or out of range) never match a
    # column -> all-zero one-hot row -> zero output row == y[mask] = 0.
    onehot = (local == cols).astype(w_ref.dtype)                # (T, V)
    out_ref[...] = jnp.dot(
        onehot, w_ref[...], preferred_element_type=jnp.float32
    ).astype(out_ref.dtype)


# ---------------------------------------------------------------------------
# Path 2: large-table path (batched, double-buffered manual row-gather DMA).
# ---------------------------------------------------------------------------
def _dma_gather_kernel(ids_smem, ids_vec_ref, w_hbm, out_ref, buf, sem, *,
                       token_tile, part_vocab, vocab_start, vocab_end,
                       world_size, num_tiles):
    i = pl.program_id(0)
    T = token_tile

    def issue_tile(tile_idx, slot):
        base = tile_idx * T
        # Static unroll: T row DMAs with static destination sublane offsets
        # (only the HBM source row index is data-dependent).  For very large
        # T this could become a fori_loop at the cost of dynamic dst offsets.
        for t in range(T):
            tok = ids_smem[base + t]
            local = jnp.clip(tok - vocab_start, 0, part_vocab - 1)
            pltpu.make_async_copy(
                w_hbm.at[pl.ds(local, 1), :],
                buf.at[slot, pl.ds(t, 1), :],
                sem.at[slot],
            ).start()

    @pl.when(i == 0)
    def _():
        issue_tile(0, 0)                       # prime the pipeline

    @pl.when(i + 1 < num_tiles)
    def _():
        issue_tile(i + 1, (i + 1) % 2)         # prefetch next tile

    slot = i % 2
    # Wait for this tile's T row copies (one wait per issued copy).
    for t in range(T):
        pltpu.make_async_copy(
            w_hbm.at[pl.ds(0, 1), :],
            buf.at[slot, pl.ds(t, 1), :],
            sem.at[slot],
        ).wait()

    tile = buf[slot]                           # (T, dim)
    if world_size > 1:
        ids_v = ids_vec_ref[...]               # (T, 1) int32, vectorized mask
        in_part = jnp.logical_and(ids_v >= vocab_start, ids_v < vocab_end)
        tile = jnp.where(in_part, tile, jnp.zeros_like(tile))
    out_ref[...] = tile.astype(out_ref.dtype)


# ---------------------------------------------------------------------------
# Wrapper.
# ---------------------------------------------------------------------------
def parallel_embedding(x, weight, *, vocab_size, world_size=1, rank=0,
                       token_tile=None,
                       max_table_vmem_bytes=4 * 1024 * 1024,
                       vmem_budget_bytes=32 * 1024 * 1024):
    """Pallas equivalent of ParallelEmbedding.forward for one rank."""
    assert vocab_size % world_size == 0
    part_vocab = vocab_size // world_size
    assert weight.shape[0] == part_vocab
    dim = weight.shape[1]
    vocab_start = rank * part_vocab
    vocab_end = vocab_start + part_vocab
    itemsize = jnp.dtype(weight.dtype).itemsize

    ids = x.reshape(-1).astype(jnp.int32)
    n = ids.shape[0]

    table_bytes = part_vocab * dim * itemsize
    # Fast path only when the table is small (VMEM resident + cheap one-hot).
    use_fast = (table_bytes <= max_table_vmem_bytes) and (part_vocab <= 2048)

    # Token tile T: multiple of 8 (dense sublane stores), sized to the VMEM
    # budget (v7x: 64 MiB physical / 32 MiB scoped default; v5e/v6e: 128 MiB).
    if token_tile is None:
        if use_fast:
            token_tile = 128
        else:
            # 2x double-buffered gather scratch + 2x pipelined output window.
            t_cap = max(8, vmem_budget_bytes // (4 * dim * itemsize))
            token_tile = int(min(128, t_cap // 8 * 8))
    T = int(min(token_tile, _round_up(n, 8)))
    T = max(8, T // 8 * 8)
    n_pad = _round_up(n, T)
    num_tiles = n_pad // T

    # Pad with an in-partition id so padded rows are safe to gather; they are
    # sliced off below.
    if n_pad != n:
        pad = jnp.full((n_pad - n,), vocab_start, dtype=jnp.int32)
        ids = jnp.concatenate([ids, pad])
    ids2d = ids.reshape(n_pad, 1)

    out_shape = jax.ShapeDtypeStruct((n_pad, dim), weight.dtype)

    if use_fast:
        kernel = functools.partial(_onehot_embed_kernel,
                                   vocab_start=vocab_start,
                                   part_vocab=part_vocab)
        cost = pl.CostEstimate(
            flops=2 * n_pad * part_vocab * dim,
            transcendentals=0,
            bytes_accessed=table_bytes + n_pad * 4 + n_pad * dim * itemsize)
        y = pl.pallas_call(
            kernel,
            out_shape=out_shape,
            grid_spec=pltpu.PrefetchScalarGridSpec(
                num_scalar_prefetch=0,
                grid=(num_tiles,),
                in_specs=[
                    pl.BlockSpec((T, 1), lambda i: (i, 0)),
                    # Full table, constant block index -> fetched once,
                    # resident across all token tiles.
                    pl.BlockSpec((part_vocab, dim), lambda i: (0, 0)),
                ],
                out_specs=pl.BlockSpec((T, dim), lambda i: (i, 0)),
            ),
            compiler_params=pltpu.CompilerParams(
                dimension_semantics=("parallel",),
                vmem_limit_bytes=vmem_budget_bytes),
            cost_estimate=cost,
        )(ids2d, weight)
    else:
        # NOTE: row-granular DMA into packed sub-32-bit layouts is fragile;
        # the large-table path is used here with 32-bit tables (bf16 tables
        # go through the fast path or should be packed to u32 first).
        kernel = functools.partial(_dma_gather_kernel,
                                   token_tile=T,
                                   part_vocab=part_vocab,
                                   vocab_start=vocab_start,
                                   vocab_end=vocab_end,
                                   world_size=world_size,
                                   num_tiles=num_tiles)
        cost = pl.CostEstimate(
            flops=0,
            transcendentals=0,
            bytes_accessed=2 * n_pad * dim * itemsize + n_pad * 4)
        y = pl.pallas_call(
            kernel,
            out_shape=out_shape,
            grid_spec=pltpu.PrefetchScalarGridSpec(
                num_scalar_prefetch=1,            # ids -> SMEM, drive row DMAs
                grid=(num_tiles,),
                in_specs=[
                    pl.BlockSpec((T, 1), lambda i, ids: (i, 0)),
                    pl.BlockSpec(memory_space=pl.ANY),   # weight stays in HBM
                ],
                out_specs=pl.BlockSpec((T, dim), lambda i, ids: (i, 0)),
                scratch_shapes=[
                    pltpu.VMEM((2, T, dim), weight.dtype),
                    pltpu.SemaphoreType.DMA((2,)),
                ],
            ),
            compiler_params=pltpu.CompilerParams(
                # Double-buffer state is carried across grid steps, so this
                # axis must stay sequential (no megacore split).
                dimension_semantics=("arbitrary",),
                vmem_limit_bytes=vmem_budget_bytes),
            cost_estimate=cost,
        )(ids, ids2d, weight)

    y = y[:n]
    # TODO(synk): dist.all_reduce(y) across world_size ranks has no
    # single-device equivalent here; on real multi-chip it would be a
    # pltpu.make_async_remote_copy ring reduction with barrier semaphores.
    return y.reshape(*x.shape, dim)


# ---------------------------------------------------------------------------
# Pure-JAX reference and tests.
# ---------------------------------------------------------------------------
def _ref_forward(x, weight, vocab_size, world_size, rank):
    """Mirrors the PyTorch forward (pre-all_reduce)."""
    part = vocab_size // world_size
    start = rank * part
    end = start + part
    if world_size > 1:
        mask = (x < start) | (x >= end)
        xl = jnp.where(mask, 0, x - start)
    else:
        xl = x
    y = weight[xl]
    if world_size > 1:
        y = jnp.where(mask[..., None], jnp.zeros_like(y), y)
    return y


def _check(name, out, ref):
    assert out.shape == ref.shape, f"{name} shape mismatch"
    ok = jnp.allclose(out.astype(jnp.float32), ref.astype(jnp.float32),
                      atol=1e-5, rtol=1e-5)
    assert bool(ok), f"{name} mismatch"


if __name__ == "__main__":
    vocab_size = 64
    dim = 128
    batch, seq = 2, 8

    key = jax.random.PRNGKey(0)
    k_ids, k_w = jax.random.split(key)
    x = jax.random.randint(k_ids, (batch, seq), 0, vocab_size, dtype=jnp.int32)

    # bf16-representable f32 weights so gathered rows compare exactly under
    # any MXU precision mode.
    w_full = jax.random.normal(k_w, (vocab_size, dim), dtype=jnp.float32)
    w_full = w_full.astype(jnp.bfloat16).astype(jnp.float32)

    # Case 1: world_size=1, f32 table, resident-table (one-hot matmul) path.
    y1 = jax.block_until_ready(
        parallel_embedding(x, w_full, vocab_size=vocab_size))
    _check("case1 (ws=1, fast path)", y1,
           _ref_forward(x, w_full, vocab_size, 1, 0))

    # Case 2: world_size=2 rank 0, bf16 table, resident-table path.
    part = vocab_size // 2
    w0_bf16 = w_full[:part].astype(jnp.bfloat16)
    y2 = jax.block_until_ready(
        parallel_embedding(x, w0_bf16, vocab_size=vocab_size,
                           world_size=2, rank=0))
    _check("case2 (ws=2 rank0, bf16, fast path)", y2,
           _ref_forward(x, w0_bf16, vocab_size, 2, 0))

    # Case 3: world_size=2 rank 1, f32, forced large-table path
    # (double-buffered manual row-gather DMA over 2 token tiles, with mask).
    w1 = w_full[part:]
    y3 = jax.block_until_ready(
        parallel_embedding(x, w1, vocab_size=vocab_size,
                           world_size=2, rank=1,
                           token_tile=8, max_table_vmem_bytes=0))
    _check("case3 (ws=2 rank1, DMA path)", y3,
           _ref_forward(x, w1, vocab_size, 2, 1))

    # Case 4: world_size=1, f32, forced large-table path (no mask branch).
    y4 = jax.block_until_ready(
        parallel_embedding(x, w_full, vocab_size=vocab_size,
                           token_tile=8, max_table_vmem_bytes=0))
    _check("case4 (ws=1, DMA path)", y4,
           _ref_forward(x, w_full, vocab_size, 1, 0))

    print("KERNEL_OK")
</pallas_src>

<mosaic_0001>
module attributes {stable_mosaic.version = 11 : i64} {
  func.func @_onehot_embed_kernel(%arg0: i32, %arg1: memref<16x1xi32, #tpu.memory_space<vmem>>, %arg2: memref<64x128xf32, #tpu.memory_space<vmem>>, %arg3: memref<16x128xf32, #tpu.memory_space<vmem>>) attributes {dimension_semantics = [#tpu.dimension_semantics<parallel>], iteration_bounds = array<i64: 1>, scalar_prefetch = 0 : i64, scratch_operands = 0 : i64, tpu.core_type = #tpu.core_type<tc>, window_params = [{transform_indices = @transform_0, window_bounds = array<i64: 16, 1>}, {pipeline_mode = #tpu.pipeline_mode<synchronous>, transform_indices = @transform_1, window_bounds = array<i64: 64, 128>}, {transform_indices = @transform_2, window_bounds = array<i64: 16, 128>}]} {
    %c0 = arith.constant 0 : index
    %c0_0 = arith.constant 0 : index
    %0 = vector.load %arg1[%c0, %c0_0] : memref<16x1xi32, #tpu.memory_space<vmem>>, vector<16x1xi32>
    %c0_i32 = arith.constant 0 : i32
    %1 = vector.broadcast %c0_i32 : i32 to vector<16x1xi32>
    %2 = arith.subi %0, %1 : vector<16x1xi32>
    %3 = tpu.iota {dimensions = array<i32: 1>} : vector<16x64xi32>
    %4 = vector.broadcast %2 : vector<16x1xi32> to vector<16x64xi32>
    %5 = arith.cmpi eq, %4, %3 : vector<16x64xi32>
    %6 = arith.extui %5 : vector<16x64xi1> to vector<16x64xi32>
    %7 = arith.sitofp %6 : vector<16x64xi32> to vector<16x64xf32>
    %c0_1 = arith.constant 0 : index
    %c0_2 = arith.constant 0 : index
    %8 = vector.load %arg2[%c0_1, %c0_2] : memref<64x128xf32, #tpu.memory_space<vmem>>, vector<64x128xf32>
    %cst = arith.constant dense<0.000000e+00> : vector<16x128xf32>
    %9 = tpu.matmul %7, %8, %cst {dimension_numbers = #tpu.dot_dimension_numbers<[1], [0], [0], [1], [0, 0, 1, 1], [], []>} : vector<16x64xf32>, vector<64x128xf32>, vector<16x128xf32> -> vector<16x128xf32>
    %c0_3 = arith.constant 0 : index
    %c0_4 = arith.constant 0 : index
    %10 = vector.load %arg3[%c0_3, %c0_4] : memref<16x128xf32, #tpu.memory_space<vmem>>, vector<16x128xf32>
    tpu.vector_store %arg3[%c0_3, %c0_4], %9 {strides = array<i32>} : memref<16x128xf32, #tpu.memory_space<vmem>>, vector<16x128xf32>,
    return
  }
  func.func @transform_0(%arg0: i32) -> (i32, i32) {
    %c0_i32 = arith.constant 0 : i32
    %c0_i32_0 = arith.constant 0 : i32
    return %arg0, %c0_i32 : i32, i32
  }
  func.func @transform_1(%arg0: i32) -> (i32, i32) {
    %c0_i32 = arith.constant 0 : i32
    %c0_i32_0 = arith.constant 0 : i32
    %c0_i32_1 = arith.constant 0 : i32
    return %c0_i32, %c0_i32_0 : i32, i32
  }
  func.func @transform_2(%arg0: i32) -> (i32, i32) {
    %c0_i32 = arith.constant 0 : i32
    %c0_i32_0 = arith.constant 0 : i32
    return %arg0, %c0_i32 : i32, i32
  }
}

</mosaic_0001>

<bundles_post_ra>
// kernel: tpu_custom_call.1
= control target key start
LH: loop header
LB: loop body
LE: loop exit
PB: predicated region body
PF: predicated region fallthrough
CT: control target
= control target key end

     0   :  { %7 = vsyncpa [#allocation3], 0  ;;  %s312_s0 = inlined_call_operand.vmem [shape: s32[16,1], index: 0, kind: input, shape index: {}]   ;;  %s313_s1 = inlined_call_operand.hbm [shape: f32[64,128], index: 1, kind: input, shape index: {}]   ;;  %s314_s2 = inlined_call_operand.hbm [shape: f32[16,128], index: 2, kind: output, shape index: {}]  }
   0x1   :  { %8 = vsyncpa [#allocation4], 0  ;;  %s255_s9 = smov [#allocation2]   ;;  %s207_s13 = scalar_lea.hbm %s313_s1, 1024 }
   0x2   :  { %s16_s10 = sshll.u32 %s255_s9, 4  ;;  %p208_p0 = scmp.ne.s32.totalorder %s313_s1, %s207_s13  ;;  %s17_s10 = int_to_ptr.vmem [resolvable:$true] %s16_s10 }
   0x3   :  { %p211_p1 = scmp.lt.u32.totalorder %s207_s13, %s313_s1 }
   0x5   :  { %p213_p2 = pnand %p211_p1, %p208_p0 }
   0x7   :  { %216 = shalt.err (!%p213_p2)
}
   0x8   :  { %s217_s18 = scalar_lea.vmem %s17_s10, 1024  ;;  %p222_p4 = scmp.lt.s32.totalorder %s17_s10, %s17_s10 }
   0x9   :  { %p218_p3 = scmp.ne.s32.totalorder %s17_s10, %s217_s18  ;;  %p223_p5 = scmp.lt.s32.totalorder %s217_s18, %s217_s18 }
   0xb   :  { %p224_p6 = por %p223_p5, %p222_p4 }
   0xd   :  { %p225_p7 = pnand %p224_p6, %p218_p3 }
   0xf   :  { %228 = shalt.err (!%p225_p7)
}
  0x10   :  { %s256_s19 = smov 128   ;;  %s257_s20 = smov 8  }
  0x11   :  { %22 = dma.hbm_to_vmem [thread:$0]  %s313_s1, 1024, %s17_s10, [#allocation3], %s256_s19, %s256_s19, %s257_s20  }
  0x12   :  { %251 = dma.done.wait [#allocation3], 1024  }
  0x13   :  { %252 = vsyncadd [#allocation3], 4294966272  ;;  %v258_v0 = vmov 0   ;;  %v26_v1 = vld [vmem:[%s312_s0] sm:$0xff]  ;;  %v43_v3 = vld [vmem:[#allocation2 + $0x8] sm:$0xff]  ;;  %v28_v15 = vlaneseq  ;;  %vm50_vm0 = vcmask 523264  }
  0x14   :  { %206 = vset.pattern.permute.xlu0 %v258_v0  ;;  %v42_v2 = vld [vmem:[#allocation2] sm:$0xff]  ;;  %v44_v4 = vld [vmem:[#allocation2 + $0x10] sm:$0xff]  ;;  %v45_v5 = vld [vmem:[#allocation2 + $0x18] sm:$0xff]  ;;  %v259_v18 = vmov 0.0  }
  0x15   :  { %31 = vperm.xlu0 %206, %v26_v1   ;;  %v27_v6 = vld [vmem:[%s312_s0 + $0x8] sm:$0xff]  ;;  %v184_v7 = vpack.c.bf16 %v43_v3, %v42_v2  ;;  %v188_v8 = vpack.c.bf16 %v45_v5, %v44_v4  ;;  %v46_v9 = vld [vmem:[#allocation2 + $0x20] sm:$0xff]  ;;  %v48_v12 = vld [vmem:[#allocation2 + $0x30] sm:$0xff]  ;;  %v29_v16 = vand.u32 127, %v28_v15  ;;  %s260_s0 = smov [#allocation5]  }
  0x16   :  { %v47_v10 = vld [vmem:[#allocation2 + $0x28] sm:$0xff]  ;;  %v49_v13 = vld [vmem:[#allocation2 + $0x38] sm:$0xff]  ;;  %s139_s1 = sshll.u32 %s260_s0, 4  ;;  %s140_s1 = int_to_ptr.vmem [resolvable:$true] %s139_s1 }
  0x17   :  { %185 = vmatprep.subr.bf16.mxu0 %v184_v7  ;;  %v192_v11 = vpack.c.bf16 %v47_v10, %v46_v9  ;;  %v196_v14 = vpack.c.bf16 %v49_v13, %v48_v12  ;;  %s229_s27 = scalar_lea.vmem %s140_s1, 256  ;;  %p234_p9 = scmp.lt.s32.totalorder %s140_s1, %s140_s1 }
  0x18   :  { %187 = vmatpush3.bf16.msra.mxu0 %v184_v7  ;;  %p230_p8 = scmp.ne.s32.totalorder %s140_s1, %s229_s27  ;;  %p235_p10 = scmp.lt.s32.totalorder %s229_s27, %s229_s27 }
  0x19   :  { %34 = vperm.xlu0 %206, %v27_v6   ;;  %189 = vmatprep.subr.bf16.mxu0 %v188_v8 }
  0x1a   :  { %p236_p11 = por %p235_p10, %p234_p9 }
  0x1c   :  { %191 = vmatpush3.bf16.msra.mxu0 %v188_v8  ;;  %p237_p12 = pnand %p236_p11, %p230_p8 }
  0x1d   :  { %193 = vmatprep.subr.bf16.mxu0 %v192_v11 }
  0x20   :  { %195 = vmatpush3.bf16.msra.mxu0 %v192_v11 }
  0x21   :  { %197 = vmatprep.subr.bf16.mxu0 %v196_v14 }
  0x24   :  { %199 = vmatpush3.bf16.msra.mxu0 %v196_v14 }
  0x94   :  { %v32_v17 = vpop.permute.xlu0 %31 }
  0x95   :  { %vm36_vm1 = vcmp.eq.s32.totalorder %v32_v17, %v29_v16 }
  0x96   :  { %v151_v19 = vsel %vm36_vm1, 1.0, %v259_v18 }
  0x97   :  { %181 = vmatprep.mubr.msk.f32.mxu0 %vm50_vm0, %v151_v19 }
  0x98   :  { %v35_v20 = vpop.permute.xlu0 %34 }
  0x99   :  { %vm37_vm2 = vcmp.eq.s32.totalorder %v35_v20, %v29_v16 }
  0x9a   :  { %v152_v21 = vsel %vm37_vm2, 1.0, %v259_v18 }
  0x9b   :  { %182 = vmatmul.mubr.msk.f32.vlgmr.msra.gmra.mrb[0].mxu0 %vm50_vm0, %v152_v21 }
 0x16e   :  { %v183_v22 = vpop.f32.mrb[0].mxu0 }
 0x16f   :  { %133 = vst [vmem:[#allocation5 + $0x8] sm:$0xff] %v183_v22  ;;  %v123_v23 = vpop.f32.mrb[1].mxu0 }
 0x170   :  { %132 = vst [vmem:[#allocation5] sm:$0xff] %v123_v23 }
 0x171   :  { %240 = shalt.err (!%p237_p12)
}
 0x172   :  { %s241_s30 = scalar_lea.hbm %s314_s2, 256 }
 0x173   :  { %p242_p13 = scmp.ne.s32.totalorder %s314_s2, %s241_s30  ;;  %p245_p0 = scmp.lt.u32.totalorder %s241_s30, %s314_s2 }
 0x175   :  { %p247_p1 = pnand %p245_p0, %p242_p13 }
 0x177   :  { %250 = shalt.err (!%p247_p1)
}
 0x178   :  { %145 = dma.vmem_to_hbm [thread:$0]  %s140_s1, 256, %s314_s2, [#allocation4], %s256_s19, %s256_s19, %s257_s20  }
 0x179   :  { %253 = dma.done.wait [#allocation4], 256  }
 0x17a   :  { %254 = vsyncadd [#allocation4], 4294967040 }
 0x17b   :  { %149 = vsyncpa [#allocation3], 1 }
 0x17c   :  { %150 = vsyncpa [#allocation4], 1 }

</bundles_post_ra>
